<compile_context>
chip_gen: v6e
topology: v6e:2x2x1
jax: 0.10.0
libtpu: 0.0.40
codegen_flags: <defaults>
</compile_context>

<pallas_src>
import jax
import jax.numpy as jnp
from jax.experimental import pallas as pl
from jax.experimental.pallas import tpu as pltpu

IN_DIM = 28 * 28          # 784
OUT_DIM = 28 * 28         # 784
OUT_PAD = 896             # 7 * 128 -> lane-dense output stores
LAYER_DIMS = [(IN_DIM, 128), (128, 64), (64, 12), (12, 64), (64, 128), (128, OUT_DIM)]


def autoencoder_kernel(
    x_ref,
    w1_ref, b1_ref,
    w2_ref, b2_ref,
    w3_ref, b3_ref,
    w4_ref, b4_ref,
    w5_ref, b5_ref,
    w6_ref, b6_ref,
    o_ref,
):
    def linear(h_f32, w_ref, b_ref):
        # bf16 (or f32) operands on the MXU, f32 accumulation, f32 bias add.
        return (
            jnp.dot(h_f32.astype(w_ref.dtype), w_ref[...],
                    preferred_element_type=jnp.float32)
            + b_ref[...]
        )

    h = x_ref[...].astype(jnp.float32)

    # Encoder: Linear(784,128)+ReLU -> Linear(128,64)+ReLU -> Linear(64,12)
    h = jnp.maximum(linear(h, w1_ref, b1_ref), 0.0)
    h = jnp.maximum(linear(h, w2_ref, b2_ref), 0.0)
    z = linear(h, w3_ref, b3_ref)

    # Decoder: Linear(12,64)+ReLU -> Linear(64,128)+ReLU -> Linear(128,784)+Sigmoid
    # TODO(synk): W3@W4 could be algebraically folded (no nonlinearity between
    # them) but is kept separate to preserve the module's exact rounding.
    d = jnp.maximum(linear(z, w4_ref, b4_ref), 0.0)
    d = jnp.maximum(linear(d, w5_ref, b5_ref), 0.0)
    d = linear(d, w6_ref, b6_ref)

    o_ref[...] = jax.nn.sigmoid(d)


def _round_up(a, m):
    return (a + m - 1) // m * m


def autoencoder_forward(x, params, *, tile_b=256, use_bf16=True):
    """x: (B, 784) float32; params: list of 6 (W[in,out], b[out]) pairs."""
    B, d_in = x.shape
    assert d_in == IN_DIM and len(params) == len(LAYER_DIMS)

    # Batch tile: >=128 rows when B allows it (MXU row occupancy), capped so
    # (x + out) blocks x 2 double-buffers stay far under v7x's 64 MiB VMEM.
    tb = min(tile_b, _round_up(B, 16))
    b_pad = _round_up(B, tb)
    x_p = jnp.pad(x, ((0, b_pad - B), (0, 0))) if b_pad != B else x

    w_dtype = jnp.bfloat16 if use_bf16 else jnp.float32

    flat_args = [x_p]
    in_specs = [pl.BlockSpec((tb, IN_DIM), lambda i: (i, 0))]
    for li, (w, b) in enumerate(params):
        w = w.astype(w_dtype)
        b = b.reshape(1, -1).astype(jnp.float32)
        if li == len(params) - 1:
            # Zero-pad the last layer's output dim 784 -> 896 for lane-dense
            # stores; padded columns are sliced off below.
            w = jnp.pad(w, ((0, 0), (0, OUT_PAD - OUT_DIM)))
            b = jnp.pad(b, ((0, 0), (0, OUT_PAD - OUT_DIM)))
        flat_args += [w, b]
        # Constant index_map -> weights/biases stay VMEM-resident across steps.
        in_specs += [
            pl.BlockSpec(w.shape, lambda i: (0, 0)),
            pl.BlockSpec(b.shape, lambda i: (0, 0)),
        ]

    grid = (b_pad // tb,)

    flops = 2 * b_pad * sum(fi * fo for fi, fo in LAYER_DIMS)
    param_bytes = sum(
        w.size * jnp.dtype(w_dtype).itemsize + b.size * 4 for w, b in params
    )
    bytes_accessed = b_pad * IN_DIM * 4 + b_pad * OUT_PAD * 4 + param_bytes

    out = pl.pallas_call(
        autoencoder_kernel,
        grid=grid,
        out_shape=jax.ShapeDtypeStruct((b_pad, OUT_PAD), jnp.float32),
        in_specs=in_specs,
        out_specs=pl.BlockSpec((tb, OUT_PAD), lambda i: (i, 0)),
        compiler_params=pltpu.CompilerParams(
            dimension_semantics=("parallel",),
        ),
        cost_estimate=pl.CostEstimate(
            flops=flops,
            transcendentals=b_pad * OUT_PAD,
            bytes_accessed=bytes_accessed,
        ),
    )(*flat_args)

    return out[:B, :OUT_DIM]


def init_params(key):
    """Deterministic init matching PyTorch Linear default; stored as (in, out)."""
    params = []
    for i, (fan_in, fan_out) in enumerate(LAYER_DIMS):
        kw, kb = jax.random.split(jax.random.fold_in(key, i))
        bound = 1.0 / jnp.sqrt(fan_in)
        w = jax.random.uniform(kw, (fan_in, fan_out), jnp.float32, -bound, bound)
        b = jax.random.uniform(kb, (fan_out,), jnp.float32, -bound, bound)
        params.append((w, b))
    return params


def reference_forward(x, params, *, matmul_dtype=jnp.float32):
    """Pure-JAX reference; matmul_dtype mimics the kernel's operand precision."""
    def lin(h, w, b):
        return jnp.dot(h.astype(matmul_dtype), w.astype(matmul_dtype),
                       preferred_element_type=jnp.float32) + b

    h = jnp.maximum(lin(x, *params[0]), 0.0)
    h = jnp.maximum(lin(h, *params[1]), 0.0)
    h = lin(h, *params[2])
    h = jnp.maximum(lin(h, *params[3]), 0.0)
    h = jnp.maximum(lin(h, *params[4]), 0.0)
    h = lin(h, *params[5])
    return jax.nn.sigmoid(h)


if __name__ == "__main__":
    key = jax.random.PRNGKey(0)
    kx, kp = jax.random.split(key)

    B = 8
    x = jax.random.uniform(kx, (B, IN_DIM), jnp.float32)  # MNIST-like pixels in [0,1)
    params = init_params(kp)

    out = jax.block_until_ready(autoencoder_forward(x, params))
    assert out.shape == (B, OUT_DIM)

    # Exact-precision check against a reference doing the same bf16-operand,
    # f32-accumulate math as the kernel.
    ref_bf16 = reference_forward(x, params, matmul_dtype=jnp.bfloat16)
    assert jnp.allclose(out, ref_bf16, atol=1e-4, rtol=1e-4), (
        "Pallas kernel mismatch vs bf16-matmul reference"
    )

    # Sanity check against the original full-f32 module semantics (bf16 operand
    # rounding bounds the post-sigmoid error well under 5e-2).
    ref_f32 = reference_forward(x, params, matmul_dtype=jnp.float32)
    assert jnp.allclose(out, ref_f32, atol=5e-2), (
        "Pallas kernel diverged from f32 reference beyond bf16 rounding bound"
    )

    print("KERNEL_OK")
</pallas_src>

<mosaic_0001>
module attributes {stable_mosaic.version = 11 : i64} {
  func.func @autoencoder_kernel(%arg0: i32, %arg1: memref<16x784xf32, #tpu.memory_space<vmem>>, %arg2: memref<784x128xbf16, #tpu.memory_space<vmem>>, %arg3: memref<1x128xf32, #tpu.memory_space<vmem>>, %arg4: memref<128x64xbf16, #tpu.memory_space<vmem>>, %arg5: memref<1x64xf32, #tpu.memory_space<vmem>>, %arg6: memref<64x12xbf16, #tpu.memory_space<vmem>>, %arg7: memref<1x12xf32, #tpu.memory_space<vmem>>, %arg8: memref<12x64xbf16, #tpu.memory_space<vmem>>, %arg9: memref<1x64xf32, #tpu.memory_space<vmem>>, %arg10: memref<64x128xbf16, #tpu.memory_space<vmem>>, %arg11: memref<1x128xf32, #tpu.memory_space<vmem>>, %arg12: memref<128x896xbf16, #tpu.memory_space<vmem>>, %arg13: memref<1x896xf32, #tpu.memory_space<vmem>>, %arg14: memref<16x896xf32, #tpu.memory_space<vmem>>) attributes {dimension_semantics = [#tpu.dimension_semantics<parallel>], iteration_bounds = array<i64: 1>, scalar_prefetch = 0 : i64, scratch_operands = 0 : i64, tpu.core_type = #tpu.core_type<tc>, window_params = [{transform_indices = @transform_0, window_bounds = array<i64: 16, 784>}, {pipeline_mode = #tpu.pipeline_mode<synchronous>, transform_indices = @transform_1, window_bounds = array<i64: 784, 128>}, {pipeline_mode = #tpu.pipeline_mode<synchronous>, transform_indices = @transform_2, window_bounds = array<i64: 1, 128>}, {pipeline_mode = #tpu.pipeline_mode<synchronous>, transform_indices = @transform_3, window_bounds = array<i64: 128, 64>}, {pipeline_mode = #tpu.pipeline_mode<synchronous>, transform_indices = @transform_4, window_bounds = array<i64: 1, 64>}, {pipeline_mode = #tpu.pipeline_mode<synchronous>, transform_indices = @transform_5, window_bounds = array<i64: 64, 12>}, {pipeline_mode = #tpu.pipeline_mode<synchronous>, transform_indices = @transform_6, window_bounds = array<i64: 1, 12>}, {pipeline_mode = #tpu.pipeline_mode<synchronous>, transform_indices = @transform_7, window_bounds = array<i64: 12, 64>}, {pipeline_mode = #tpu.pipeline_mode<synchronous>, transform_indices = @transform_8, window_bounds = array<i64: 1, 64>}, {pipeline_mode = #tpu.pipeline_mode<synchronous>, transform_indices = @transform_9, window_bounds = array<i64: 64, 128>}, {pipeline_mode = #tpu.pipeline_mode<synchronous>, transform_indices = @transform_10, window_bounds = array<i64: 1, 128>}, {pipeline_mode = #tpu.pipeline_mode<synchronous>, transform_indices = @transform_11, window_bounds = array<i64: 128, 896>}, {pipeline_mode = #tpu.pipeline_mode<synchronous>, transform_indices = @transform_12, window_bounds = array<i64: 1, 896>}, {transform_indices = @transform_13, window_bounds = array<i64: 16, 896>}]} {
    %c0 = arith.constant 0 : index
    %c0_0 = arith.constant 0 : index
    %0 = vector.load %arg1[%c0, %c0_0] : memref<16x784xf32, #tpu.memory_space<vmem>>, vector<16x784xf32>
    %1 = arith.truncf %0 : vector<16x784xf32> to vector<16x784xbf16>
    %c0_1 = arith.constant 0 : index
    %c0_2 = arith.constant 0 : index
    %2 = vector.load %arg2[%c0_1, %c0_2] : memref<784x128xbf16, #tpu.memory_space<vmem>>, vector<784x128xbf16>
    %cst = arith.constant dense<0.000000e+00> : vector<16x128xf32>
    %3 = tpu.matmul %1, %2, %cst {dimension_numbers = #tpu.dot_dimension_numbers<[1], [0], [0], [1], [0, 0, 1, 1], [], []>} : vector<16x784xbf16>, vector<784x128xbf16>, vector<16x128xf32> -> vector<16x128xf32>
    %c0_3 = arith.constant 0 : index
    %c0_4 = arith.constant 0 : index
    %4 = vector.load %arg3[%c0_3, %c0_4] : memref<1x128xf32, #tpu.memory_space<vmem>>, vector<1x128xf32>
    %5 = vector.broadcast %4 : vector<1x128xf32> to vector<16x128xf32>
    %6 = arith.addf %3, %5 : vector<16x128xf32>
    %cst_5 = arith.constant 0.000000e+00 : f32
    %7 = vector.broadcast %cst_5 : f32 to vector<16x128xf32>
    %8 = arith.maximumf %6, %7 : vector<16x128xf32>
    %9 = arith.truncf %8 : vector<16x128xf32> to vector<16x128xbf16>
    %c0_6 = arith.constant 0 : index
    %c0_7 = arith.constant 0 : index
    %10 = vector.load %arg4[%c0_6, %c0_7] : memref<128x64xbf16, #tpu.memory_space<vmem>>, vector<128x64xbf16>
    %cst_8 = arith.constant dense<0.000000e+00> : vector<16x64xf32>
    %11 = tpu.matmul %9, %10, %cst_8 {dimension_numbers = #tpu.dot_dimension_numbers<[1], [0], [0], [1], [0, 0, 1, 1], [], []>} : vector<16x128xbf16>, vector<128x64xbf16>, vector<16x64xf32> -> vector<16x64xf32>
    %c0_9 = arith.constant 0 : index
    %c0_10 = arith.constant 0 : index
    %12 = vector.load %arg5[%c0_9, %c0_10] : memref<1x64xf32, #tpu.memory_space<vmem>>, vector<1x64xf32>
    %13 = vector.broadcast %12 : vector<1x64xf32> to vector<16x64xf32>
    %14 = arith.addf %11, %13 : vector<16x64xf32>
    %cst_11 = arith.constant 0.000000e+00 : f32
    %15 = vector.broadcast %cst_11 : f32 to vector<16x64xf32>
    %16 = arith.maximumf %14, %15 : vector<16x64xf32>
    %17 = arith.truncf %16 : vector<16x64xf32> to vector<16x64xbf16>
    %c0_12 = arith.constant 0 : index
    %c0_13 = arith.constant 0 : index
    %18 = vector.load %arg6[%c0_12, %c0_13] : memref<64x12xbf16, #tpu.memory_space<vmem>>, vector<64x12xbf16>
    %cst_14 = arith.constant dense<0.000000e+00> : vector<16x12xf32>
    %19 = tpu.matmul %17, %18, %cst_14 {dimension_numbers = #tpu.dot_dimension_numbers<[1], [0], [0], [1], [0, 0, 1, 1], [], []>} : vector<16x64xbf16>, vector<64x12xbf16>, vector<16x12xf32> -> vector<16x12xf32>
    %c0_15 = arith.constant 0 : index
    %c0_16 = arith.constant 0 : index
    %20 = vector.load %arg7[%c0_15, %c0_16] : memref<1x12xf32, #tpu.memory_space<vmem>>, vector<1x12xf32>
    %21 = vector.broadcast %20 : vector<1x12xf32> to vector<16x12xf32>
    %22 = arith.addf %19, %21 : vector<16x12xf32>
    %23 = arith.truncf %22 : vector<16x12xf32> to vector<16x12xbf16>
    %c0_17 = arith.constant 0 : index
    %c0_18 = arith.constant 0 : index
    %24 = vector.load %arg8[%c0_17, %c0_18] : memref<12x64xbf16, #tpu.memory_space<vmem>>, vector<12x64xbf16>
    %cst_19 = arith.constant dense<0.000000e+00> : vector<16x64xf32>
    %25 = tpu.matmul %23, %24, %cst_19 {dimension_numbers = #tpu.dot_dimension_numbers<[1], [0], [0], [1], [0, 0, 1, 1], [], []>} : vector<16x12xbf16>, vector<12x64xbf16>, vector<16x64xf32> -> vector<16x64xf32>
    %c0_20 = arith.constant 0 : index
    %c0_21 = arith.constant 0 : index
    %26 = vector.load %arg9[%c0_20, %c0_21] : memref<1x64xf32, #tpu.memory_space<vmem>>, vector<1x64xf32>
    %27 = vector.broadcast %26 : vector<1x64xf32> to vector<16x64xf32>
    %28 = arith.addf %25, %27 : vector<16x64xf32>
    %cst_22 = arith.constant 0.000000e+00 : f32
    %29 = vector.broadcast %cst_22 : f32 to vector<16x64xf32>
    %30 = arith.maximumf %28, %29 : vector<16x64xf32>
    %31 = arith.truncf %30 : vector<16x64xf32> to vector<16x64xbf16>
    %c0_23 = arith.constant 0 : index
    %c0_24 = arith.constant 0 : index
    %32 = vector.load %arg10[%c0_23, %c0_24] : memref<64x128xbf16, #tpu.memory_space<vmem>>, vector<64x128xbf16>
    %cst_25 = arith.constant dense<0.000000e+00> : vector<16x128xf32>
    %33 = tpu.matmul %31, %32, %cst_25 {dimension_numbers = #tpu.dot_dimension_numbers<[1], [0], [0], [1], [0, 0, 1, 1], [], []>} : vector<16x64xbf16>, vector<64x128xbf16>, vector<16x128xf32> -> vector<16x128xf32>
    %c0_26 = arith.constant 0 : index
    %c0_27 = arith.constant 0 : index
    %34 = vector.load %arg11[%c0_26, %c0_27] : memref<1x128xf32, #tpu.memory_space<vmem>>, vector<1x128xf32>
    %35 = vector.broadcast %34 : vector<1x128xf32> to vector<16x128xf32>
    %36 = arith.addf %33, %35 : vector<16x128xf32>
    %cst_28 = arith.constant 0.000000e+00 : f32
    %37 = vector.broadcast %cst_28 : f32 to vector<16x128xf32>
    %38 = arith.maximumf %36, %37 : vector<16x128xf32>
    %39 = arith.truncf %38 : vector<16x128xf32> to vector<16x128xbf16>
    %c0_29 = arith.constant 0 : index
    %c0_30 = arith.constant 0 : index
    %40 = vector.load %arg12[%c0_29, %c0_30] : memref<128x896xbf16, #tpu.memory_space<vmem>>, vector<128x896xbf16>
    %cst_31 = arith.constant dense<0.000000e+00> : vector<16x896xf32>
    %41 = tpu.matmul %39, %40, %cst_31 {dimension_numbers = #tpu.dot_dimension_numbers<[1], [0], [0], [1], [0, 0, 1, 1], [], []>} : vector<16x128xbf16>, vector<128x896xbf16>, vector<16x896xf32> -> vector<16x896xf32>
    %c0_32 = arith.constant 0 : index
    %c0_33 = arith.constant 0 : index
    %42 = vector.load %arg13[%c0_32, %c0_33] : memref<1x896xf32, #tpu.memory_space<vmem>>, vector<1x896xf32>
    %43 = vector.broadcast %42 : vector<1x896xf32> to vector<16x896xf32>
    %44 = arith.addf %41, %43 : vector<16x896xf32>
    %45 = arith.negf %44 : vector<16x896xf32>
    %46 = math.exp %45 : vector<16x896xf32>
    %cst_34 = arith.constant 1.000000e+00 : f32
    %47 = vector.broadcast %cst_34 : f32 to vector<16x896xf32>
    %48 = arith.addf %47, %46 : vector<16x896xf32>
    %49 = arith.divf %47, %48 : vector<16x896xf32>
    %c0_35 = arith.constant 0 : index
    %c0_36 = arith.constant 0 : index
    %50 = vector.load %arg14[%c0_35, %c0_36] : memref<16x896xf32, #tpu.memory_space<vmem>>, vector<16x896xf32>
    tpu.vector_store %arg14[%c0_35, %c0_36], %49 {strides = array<i32>} : memref<16x896xf32, #tpu.memory_space<vmem>>, vector<16x896xf32>,
    return
  }
  func.func @transform_0(%arg0: i32) -> (i32, i32) {
    %c0_i32 = arith.constant 0 : i32
    %c0_i32_0 = arith.constant 0 : i32
    return %arg0, %c0_i32 : i32, i32
  }
  func.func @transform_1(%arg0: i32) -> (i32, i32) {
    %c0_i32 = arith.constant 0 : i32
    %c0_i32_0 = arith.constant 0 : i32
    %c0_i32_1 = arith.constant 0 : i32
    return %c0_i32, %c0_i32_0 : i32, i32
  }
  func.func @transform_2(%arg0: i32) -> (i32, i32) {
    %c0_i32 = arith.constant 0 : i32
    %c0_i32_0 = arith.constant 0 : i32
    %c0_i32_1 = arith.constant 0 : i32
    return %c0_i32, %c0_i32_0 : i32, i32
  }
  func.func @transform_3(%arg0: i32) -> (i32, i32) {
    %c0_i32 = arith.constant 0 : i32
    %c0_i32_0 = arith.constant 0 : i32
    %c0_i32_1 = arith.constant 0 : i32
    return %c0_i32, %c0_i32_0 : i32, i32
  }
  func.func @transform_4(%arg0: i32) -> (i32, i32) {
    %c0_i32 = arith.constant 0 : i32
    %c0_i32_0 = arith.constant 0 : i32
    %c0_i32_1 = arith.constant 0 : i32
    return %c0_i32, %c0_i32_0 : i32, i32
  }
  func.func @transform_5(%arg0: i32) -> (i32, i32) {
    %c0_i32 = arith.constant 0 : i32
    %c0_i32_0 = arith.constant 0 : i32
    %c0_i32_1 = arith.constant 0 : i32
    return %c0_i32, %c0_i32_0 : i32, i32
  }
  func.func @transform_6(%arg0: i32) -> (i32, i32) {
    %c0_i32 = arith.constant 0 : i32
    %c0_i32_0 = arith.constant 0 : i32
    %c0_i32_1 = arith.constant 0 : i32
    return %c0_i32, %c0_i32_0 : i32, i32
  }
  func.func @transform_7(%arg0: i32) -> (i32, i32) {
    %c0_i32 = arith.constant 0 : i32
    %c0_i32_0 = arith.constant 0 : i32
    %c0_i32_1 = arith.constant 0 : i32
    return %c0_i32, %c0_i32_0 : i32, i32
  }
  func.func @transform_8(%arg0: i32) -> (i32, i32) {
    %c0_i32 = arith.constant 0 : i32
    %c0_i32_0 = arith.constant 0 : i32
    %c0_i32_1 = arith.constant 0 : i32
    return %c0_i32, %c0_i32_0 : i32, i32
  }
  func.func @transform_9(%arg0: i32) -> (i32, i32) {
    %c0_i32 = arith.constant 0 : i32
    %c0_i32_0 = arith.constant 0 : i32
    %c0_i32_1 = arith.constant 0 : i32
    return %c0_i32, %c0_i32_0 : i32, i32
  }
  func.func @transform_10(%arg0: i32) -> (i32, i32) {
    %c0_i32 = arith.constant 0 : i32
    %c0_i32_0 = arith.constant 0 : i32
    %c0_i32_1 = arith.constant 0 : i32
    return %c0_i32, %c0_i32_0 : i32, i32
  }
  func.func @transform_11(%arg0: i32) -> (i32, i32) {
    %c0_i32 = arith.constant 0 : i32
    %c0_i32_0 = arith.constant 0 : i32
    %c0_i32_1 = arith.constant 0 : i32
    return %c0_i32, %c0_i32_0 : i32, i32
  }
  func.func @transform_12(%arg0: i32) -> (i32, i32) {
    %c0_i32 = arith.constant 0 : i32
    %c0_i32_0 = arith.constant 0 : i32
    %c0_i32_1 = arith.constant 0 : i32
    return %c0_i32, %c0_i32_0 : i32, i32
  }
  func.func @transform_13(%arg0: i32) -> (i32, i32) {
    %c0_i32 = arith.constant 0 : i32
    %c0_i32_0 = arith.constant 0 : i32
    return %arg0, %c0_i32 : i32, i32
  }
}

</mosaic_0001>

<bundles_post_ra>
// kernel: tpu_custom_call.1
= control target key start
LH: loop header
LB: loop body
LE: loop exit
PB: predicated region body
PF: predicated region fallthrough
CT: control target
= control target key end

     0   :  { %18 = vsyncpa [#allocation3], 0  ;;  %s2693_s0 = inlined_call_operand.vmem [shape: f32[16,784], index: 0, kind: input, shape index: {}]   ;;  %s2694_s1 = inlined_call_operand.hbm [shape: bf16[784,128], index: 1, kind: input, shape index: {}]   ;;  %s2695_s2 = inlined_call_operand.vmem [shape: f32[1,128], index: 2, kind: input, shape index: {}]   ;;  %s2696_s3 = inlined_call_operand.vmem [shape: bf16[128,64], index: 3, kind: input, shape index: {}]   ;;  %s2697_s4 = inlined_call_operand.hbm [shape: f32[1,64], index: 4, kind: input, shape index: {}]   ;;  %s2698_s5 = inlined_call_operand.vmem [shape: bf16[64,12], index: 5, kind: input, shape index: {}]   ;;  %s2699_s6 = inlined_call_operand.hbm [shape: f32[1,12], index: 6, kind: input, shape index: {}]   ;;  %s2700_s7 = inlined_call_operand.hbm [shape: bf16[12,64], index: 7, kind: input, shape index: {}]   ;;  %s2701_s8 = inlined_call_operand.hbm [shape: f32[1,64], index: 8, kind: input, shape index: {}]   ;;  %s2702_s9 = inlined_call_operand.vmem [shape: bf16[64,128], index: 9, kind: input, shape index: {}]   ;;  %s2703_s10 = inlined_call_operand.vmem [shape: f32[1,128], index: 10, kind: input, shape index: {}]   ;;  %s2704_s11 = inlined_call_operand.hbm [shape: bf16[128,896], index: 11, kind: input, shape index: {}]   ;;  %s2705_s12 = inlined_call_operand.vmem [shape: f32[1,896], index: 12, kind: input, shape index: {}]   ;;  %s2706_s13 = inlined_call_operand.hbm [shape: f32[16,896], index: 13, kind: output, shape index: {}]  }
   0x1   :  { %19 = vsyncpa [#allocation6], 0 }
   0x2   :  { %20 = vsyncpa [#allocation9], 0 }
   0x3   :  { %21 = vsyncpa [#allocation12], 0 }
   0x4   :  { %22 = vsyncpa [#allocation4], 0  ;;  %s2429_s25 = smov [#allocation5]  }
   0x5   :  { %s47_s26 = sshll.u32 %s2429_s25, 4  ;;  %s48_s26 = int_to_ptr.vmem [resolvable:$true] %s47_s26 }
   0x6   :  { %s2287_s27 = scalar_lea.vmem %s48_s26, 16  ;;  %s2291_s28 = scalar_lea.vmem %s48_s26, 32 }
   0x7   :  { %p2288_p0 = scmp.ne.s32.totalorder %s48_s26, %s2287_s27  ;;  %p2292_p1 = scmp.lt.s32.totalorder %s48_s26, %s48_s26 }
   0x8   :  { %p2293_p2 = scmp.lt.s32.totalorder %s2291_s28, %s2287_s27 }
   0xa   :  { %p2294_p3 = por %p2293_p2, %p2292_p1 }
   0xc   :  { %p2295_p4 = pnand %p2294_p3, %p2288_p0 }
   0xe   :  { %2298 = shalt.err (!%p2295_p4)
}
   0xf   :  { %50 = dma.hbm_to_vmem [thread:$0]  %s2697_s4, 16, %s48_s26, [#allocation6]  }
  0x10   :  { %s2430_s14 = smov [#allocation8]   ;;  %s2431_s16 = smov [#allocation2]  }
  0x11   :  { %s68_s15 = sshll.u32 %s2430_s14, 4  ;;  %s30_s17 = sshll.u32 %s2431_s16, 4  ;;  %s69_s15 = int_to_ptr.vmem [resolvable:$true] %s68_s15  ;;  %s31_s17 = int_to_ptr.vmem [resolvable:$true] %s30_s17 }
  0x12   :  { %s2307_s18 = scalar_lea.vmem %s69_s15, 128  ;;  %p2312_p6 = scmp.lt.s32.totalorder %s69_s15, %s69_s15 }
  0x13   :  { %p2308_p5 = scmp.ne.s32.totalorder %s69_s15, %s2307_s18  ;;  %p2313_p7 = scmp.lt.s32.totalorder %s2307_s18, %s2307_s18 }
  0x15   :  { %p2314_p8 = por %p2313_p7, %p2312_p6 }
  0x17   :  { %p2315_p9 = pnand %p2314_p8, %p2308_p5 }
  0x19   :  { %2318 = shalt.err (!%p2315_p9)
}
  0x1a   :  { %s2432_s19 = smov 64   ;;  %s2433_s20 = smov 4  }
  0x1b   :  { %74 = dma.hbm_to_vmem [thread:$0]  %s2700_s7, 128, %s69_s15, [#allocation9], %s2432_s19, %s2432_s19, %s2433_s20  }
  0x1c   :  { %s2327_s4 = scalar_lea.vmem %s31_s17, 6272  ;;  %p2332_p11 = scmp.lt.s32.totalorder %s31_s17, %s31_s17 }
  0x1d   :  { %p2328_p10 = scmp.ne.s32.totalorder %s31_s17, %s2327_s4  ;;  %p2333_p12 = scmp.lt.s32.totalorder %s2327_s4, %s2327_s4 }
  0x1f   :  { %p2334_p13 = por %p2333_p12, %p2332_p11 }
  0x21   :  { %p2335_p0 = pnand %p2334_p13, %p2328_p10 }
  0x23   :  { %2338 = shalt.err (!%p2335_p0)
}
  0x24   :  { %36 = dma.hbm_to_vmem [thread:$0]  %s2694_s1, 6272, %s31_s17, [#allocation3], %s2432_s19, %s2432_s19, %s2433_s20  }
  0x25   :  { %s2434_s25 = smov [#allocation7]   ;;  %s2435_s27 = smov [#allocation10]  }
  0x26   :  { %s59_s26 = sshll.u32 %s2434_s25, 4  ;;  %s81_s28 = sshll.u32 %s2435_s27, 4  ;;  %s60_s26 = int_to_ptr.vmem [resolvable:$true] %s59_s26  ;;  %s82_s28 = int_to_ptr.vmem [resolvable:$true] %s81_s28 }
  0x27   :  { %s2347_s29 = scalar_lea.vmem %s60_s26, 16  ;;  %s2351_s7 = scalar_lea.vmem %s60_s26, 32 }
  0x28   :  { %p2348_p1 = scmp.ne.s32.totalorder %s60_s26, %s2347_s29  ;;  %p2352_p2 = scmp.lt.s32.totalorder %s60_s26, %s60_s26 }
  0x29   :  { %p2353_p3 = scmp.lt.s32.totalorder %s2351_s7, %s2347_s29 }
  0x2b   :  { %p2354_p4 = por %p2353_p3, %p2352_p2 }
  0x2d   :  { %p2355_p5 = pnand %p2354_p4, %p2348_p1 }
  0x2f   :  { %2358 = shalt.err (!%p2355_p5)
}
  0x30   :  { %62 = dma.hbm_to_vmem [thread:$0]  %s2699_s6, 16, %s60_s26, [#allocation6]  }
  0x31   :  { %s2367_s15 = scalar_lea.vmem %s82_s28, 16  ;;  %s2371_s1 = scalar_lea.vmem %s82_s28, 32 }
  0x32   :  { %p2368_p6 = scmp.ne.s32.totalorder %s82_s28, %s2367_s15  ;;  %p2372_p7 = scmp.lt.s32.totalorder %s82_s28, %s82_s28 }
  0x33   :  { %p2373_p8 = scmp.lt.s32.totalorder %s2371_s1, %s2367_s15 }
  0x35   :  { %p2374_p9 = por %p2373_p8, %p2372_p7 }
  0x37   :  { %p2375_p10 = pnand %p2374_p9, %p2368_p6 }
  0x39   :  { %2378 = shalt.err (!%p2375_p10)
}
  0x3a   :  { %84 = dma.hbm_to_vmem [thread:$0]  %s2701_s8, 16, %s82_s28, [#allocation9]  }
  0x3b   :  { %s2436_s18 = smov [#allocation11]  }
  0x3c   :  { %s94_s19 = sshll.u32 %s2436_s18, 4  ;;  %s95_s19 = int_to_ptr.vmem [resolvable:$true] %s94_s19 }
  0x3d   :  { %s2387_s20 = scalar_lea.vmem %s95_s19, 7168  ;;  %p2392_p12 = scmp.lt.s32.totalorder %s95_s19, %s95_s19 }
  0x3e   :  { %p2388_p11 = scmp.ne.s32.totalorder %s95_s19, %s2387_s20  ;;  %p2393_p13 = scmp.lt.s32.totalorder %s2387_s20, %s2387_s20 }
  0x40   :  { %p2394_p0 = por %p2393_p13, %p2392_p12 }
  0x42   :  { %p2395_p1 = pnand %p2394_p0, %p2388_p11 }
  0x44   :  { %2398 = shalt.err (!%p2395_p1)
}
  0x45   :  { %s2437_s6 = smov 448   ;;  %s2438_s21 = smov 28  }
  0x46   :  { %100 = dma.hbm_to_vmem [thread:$0]  %s2704_s11, 7168, %s95_s19, [#allocation12], %s2437_s6, %s2437_s6, %s2438_s21  }
  0x47   :  { %2419 = dma.done.wait [#allocation3], 6272  }
  0x48   :  { %2420 = vsyncadd [#allocation3], 4294961024 }
  0x49   :  { %2421 = dma.done.wait [#allocation6], 32  }
  0x4a   :  { %2422 = vsyncadd [#allocation6], 4294967264 }
  0x4b   :  { %2423 = dma.done.wait [#allocation9], 144  }
  0x4c   :  { %2424 = vsyncadd [#allocation9], 4294967152 }
  0x4d   :  { %2425 = dma.done.wait [#allocation12], 7168  }
  0x4e   :  { %2426 = vsyncadd [#allocation12], 4294960128  ;;  %v2077_v0 = vld [vmem:[#allocation2 + $0x78] sm:$0xff]   ;;  %v2081_v4 = vld [vmem:[#allocation2 + $0x70] sm:$0xff]   ;;  %v2439_v43 = vmov 0.0   ;;  %vm2440_vm0 = vmmov 0  }
  0x4f   :  { %v2078_v1 = vld [vmem:[#allocation2 + $0x38] sm:$0xff]   ;;  %1887 = vmatprep.subr.bf16.mxu0 %v2077_v0  ;;  %v2082_v5 = vld [vmem:[#allocation2 + $0x30] sm:$0xff]   ;;  %v2085_v8 = vld [vmem:[#allocation2 + $0x68] sm:$0xff]   ;;  %vm542_vm1 = vcmask 130048   ;;  %vm867_vm2 = vcmask 523264   ;;  %vm931_vm3 = vcmask 1045504  }
  0x50   :  { %v2079_v2 = vld [vmem:[#allocation2 + $0xf8] sm:$0xff]   ;;  %1888 = vmatpush3.bf16.msra.mxu0 %v2078_v1  ;;  %v2083_v6 = vld [vmem:[#allocation2 + $0xf0] sm:$0xff]   ;;  %v2086_v9 = vld [vmem:[#allocation2 + $0x28] sm:$0xff]   ;;  %vm927_vm4 = vcmask 97280  }
  0x51   :  { %v2080_v3 = vld [vmem:[#allocation2 + $0xb8] sm:$0xff]   ;;  %1909 = vmatprep.subr.bf16.mxu1 %v2079_v2  ;;  %1889 = vmatprep.subr.bf16.mxu0 %v2081_v4  ;;  %v2084_v7 = vld [vmem:[#allocation2 + $0xb0] sm:$0xff]   ;;  %v2087_v10 = vld [vmem:[#allocation2 + $0xe8] sm:$0xff]  }
  0x52   :  { %1910 = vmatpush3.bf16.msra.mxu1 %v2080_v3  ;;  %v2088_v11 = vld [vmem:[#allocation2 + $0xa8] sm:$0xff]   ;;  %v2089_v12 = vld [vmem:[#allocation2 + $0x60] sm:$0xff]   ;;  %v2093_v16 = vld [vmem:[#allocation2 + $0x58] sm:$0xff]  }
  0x53   :  { %1911 = vmatprep.subr.bf16.mxu1 %v2083_v6  ;;  %v2090_v13 = vld [vmem:[#allocation2 + $0x20] sm:$0xff]   ;;  %v2094_v17 = vld [vmem:[#allocation2 + $0x18] sm:$0xff]   ;;  %v2097_v20 = vld [vmem:[#allocation2 + $0x50] sm:$0xff]  }
  0x54   :  { %1890 = vmatpush3.bf16.msra.mxu0 %v2082_v5  ;;  %v2091_v14 = vld [vmem:[#allocation2 + $0xe0] sm:$0xff]   ;;  %v2095_v18 = vld [vmem:[#allocation2 + $0xd8] sm:$0xff]   ;;  %v2098_v21 = vld [vmem:[#allocation2 + $0x10] sm:$0xff]  }
  0x55   :  { %1891 = vmatprep.subr.bf16.mxu0 %v2085_v8  ;;  %v2092_v15 = vld [vmem:[#allocation2 + $0xa0] sm:$0xff]   ;;  %v2096_v19 = vld [vmem:[#allocation2 + $0x98] sm:$0xff]   ;;  %v2099_v22 = vld [vmem:[#allocation2 + $0xd0] sm:$0xff]  }
  0x56   :  { %1912 = vmatpush3.bf16.msra.mxu1 %v2084_v7  ;;  %v2100_v23 = vld [vmem:[#allocation2 + $0x90] sm:$0xff]   ;;  %v2101_v24 = vld [vmem:[#allocation2 + $0x48] sm:$0xff]   ;;  %v2105_v28 = vld [vmem:[#allocation2 + $0x40] sm:$0xff]  }
  0x57   :  { %1913 = vmatprep.subr.bf16.mxu1 %v2087_v10  ;;  %v2102_v25 = vld [vmem:[#allocation2 + $0x8] sm:$0xff]   ;;  %v2106_v29 = vld [vmem:[#allocation2] sm:$0xff]   ;;  %v129_v36 = vld [vmem:[%s2693_s0 + $0x38] sm:$0xff] }
  0x58   :  { %1892 = vmatpush3.bf16.msra.mxu0 %v2086_v9  ;;  %v2103_v26 = vld [vmem:[#allocation2 + $0xc8] sm:$0xff]   ;;  %v2107_v30 = vld [vmem:[#allocation2 + $0xc0] sm:$0xff]   ;;  %v2109_v38 = vld [vmem:[#allocation2 + $0x178] sm:$0xff]  }
  0x59   :  { %1893 = vmatprep.subr.bf16.mxu0 %v2089_v12  ;;  %v2104_v27 = vld [vmem:[#allocation2 + $0x88] sm:$0xff]   ;;  %v130_v32 = vld [vmem:[%s2693_s0 + $0x40] sm:$0xff]  ;;  %v125_v39 = vld [vmem:[%s2693_s0 + $0x18] sm:$0xff] }
  0x5a   :  { %1914 = vmatpush3.bf16.msra.mxu1 %v2088_v11  ;;  %v123_v31 = vld [vmem:[%s2693_s0 + $0x8] sm:$0xff]  ;;  %v2108_v34 = vld [vmem:[#allocation2 + $0x80] sm:$0xff]   ;;  %v132_v40 = vld [vmem:[%s2693_s0 + $0x50] sm:$0xff] }
  0x5b   :  { %1915 = vmatprep.subr.bf16.mxu1 %v2091_v14  ;;  %v137_v33 = vpack.c.bf16 %v130_v32, %v123_v31  ;;  %v122_v35 = vld [vmem:[%s2693_s0] sm:$0xff]  ;;  %v139_v41 = vpack.c.bf16 %v132_v40, %v125_v39  ;;  %v2110_v42 = vld [vmem:[#allocation2 + $0x138] sm:$0xff]   ;;  %v124_v44 = vld [vmem:[%s2693_s0 + $0x10] sm:$0xff] }
  0x5c   :  { %1894 = vmatpush3.bf16.msra.mxu0 %v2090_v13  ;;  %v136_v37 = vpack.c.bf16 %v129_v36, %v122_v35  ;;  %v131_v45 = vld [vmem:[%s2693_s0 + $0x48] sm:$0xff]  ;;  %v2111_v47 = vld [vmem:[#allocation2 + $0x170] sm:$0xff]   ;;  %v2115_v51 = vld [vmem:[#allocation2 + $0x160] sm:$0xff]  }
  0x5d   :  { %1895 = vmatprep.subr.bf16.mxu0 %v2093_v16  ;;  %578 = vmatprep.mubr.bf16.mxu0 %v137_v33  ;;  %v138_v46 = vpack.c.bf16 %v131_v45, %v124_v44  ;;  %v2112_v48 = vld [vmem:[#allocation2 + $0x130] sm:$0xff]   ;;  %v2113_v49 = vld [vmem:[#allocation2 + $0x168] sm:$0xff]   ;;  %v2116_v52 = vld [vmem:[#allocation2 + $0x120] sm:$0xff]  }
  0x5e   :  { %1916 = vmatpush3.bf16.msra.mxu1 %v2092_v15  ;;  %619 = vmatprep.mubr.bf16.mxu1 %v139_v41  ;;  %v2114_v50 = vld [vmem:[#allocation2 + $0x128] sm:$0xff]   ;;  %v2117_v53 = vld [vmem:[#allocation2 + $0x158] sm:$0xff]   ;;  %v2119_v55 = vld [vmem:[#allocation2 + $0x150] sm:$0xff]  }
  0x5f   :  { %1917 = vmatprep.subr.bf16.mxu1 %v2095_v18  ;;  %v2118_v54 = vld [vmem:[#allocation2 + $0x118] sm:$0xff]   ;;  %v2125_v56 = vld [vmem:[#allocation2 + $0x180] sm:$0xff]   ;;  %v127_v57 = vld [vmem:[%s2693_s0 + $0x28] sm:$0xff] }
  0x60   :  { %1896 = vmatpush3.bf16.msra.mxu0 %v2094_v17  ;;  %v2120_v58 = vld [vmem:[#allocation2 + $0x110] sm:$0xff]   ;;  %v2121_v59 = vld [vmem:[#allocation2 + $0x148] sm:$0xff]   ;;  %v134_v60 = vld [vmem:[%s2693_s0 + $0x60] sm:$0xff] }
  0x61   :  { %1897 = vmatprep.subr.bf16.mxu0 %v2097_v20  ;;  %v141_v61 = vpack.c.bf16 %v134_v60, %v127_v57  ;;  %v128_v62 = vld [vmem:[%s2693_s0 + $0x30] sm:$0xff]  ;;  %v135_v63 = vld [vmem:[%s2693_s0 + $0x68] sm:$0xff]  ;;  %v2123_v2 = vld [vmem:[#allocation2 + $0x140] sm:$0xff]  }
  0x62   :  { %1918 = vmatpush3.bf16.msra.mxu1 %v2096_v19  ;;  %v142_v0 = vpack.c.bf16 %v135_v63, %v128_v62  ;;  %v2122_v1 = vld [vmem:[#allocation2 + $0x108] sm:$0xff]   ;;  %v2124_v3 = vld [vmem:[#allocation2 + $0x100] sm:$0xff]   ;;  %v133_v5 = vld [vmem:[%s2693_s0 + $0x58] sm:$0xff] }
  0x63   :  { %1919 = vmatprep.subr.bf16.mxu1 %v2099_v22  ;;  %v126_v4 = vld [vmem:[%s2693_s0 + $0x20] sm:$0xff]  ;;  %v2126_v7 = vld [vmem:[%s2696_s3 + $0x38] sm:$0xff]   ;;  %v2127_v8 = vld [vmem:[%s2696_s3 + $0x30] sm:$0xff]  }
  0x64   :  { %1898 = vmatpush3.bf16.msra.mxu0 %v2098_v21  ;;  %v140_v6 = vpack.c.bf16 %v133_v5, %v126_v4  ;;  %v2128_v9 = vld [vmem:[%s2696_s3 + $0x28] sm:$0xff]   ;;  %v2129_v10 = vld [vmem:[%s2696_s3 + $0x20] sm:$0xff]   ;;  %v2130_v11 = vld [vmem:[%s2696_s3 + $0x18] sm:$0xff]  }
  0x65   :  { %1899 = vmatprep.subr.bf16.mxu0 %v2101_v24  ;;  %v2131_v12 = vld [vmem:[%s2696_s3 + $0x10] sm:$0xff]   ;;  %v2132_v13 = vld [vmem:[%s2696_s3 + $0x8] sm:$0xff]   ;;  %v2133_v14 = vld [vmem:[%s2696_s3] sm:$0xff]  }
  0x66   :  { %1920 = vmatpush3.bf16.msra.mxu1 %v2100_v23  ;;  %v2134_v15 = vld [vmem:[%s2698_s5 + $0x18] sm:$0xff]   ;;  %v1802_v4 = vld [vmem:[#allocation7] ss:$0 sm:$0xff] }
  0x67   :  { %1921 = vmatprep.subr.bf16.mxu1 %v2103_v26 }
  0x68   :  { %1900 = vmatpush3.bf16.msra.mxu0 %v2102_v25 }
  0x69   :  { %1901 = vmatprep.subr.bf16.mxu0 %v2105_v28  ;;  %v1742_v28 = vld [vmem:[%s2695_s2] ss:$0 sm:$0xff] }
  0x6a   :  { %1922 = vmatpush3.bf16.msra.mxu1 %v2104_v27 }
  0x6b   :  { %1923 = vmatprep.subr.bf16.mxu1 %v2107_v30 }
  0x6c   :  { %1902 = vmatpush3.bf16.msra.mxu0 %v2106_v29 }
  0x6d   :  { %1931 = vmatprep.subr.bf16.mxu0 %v2109_v38 }
  0x6e   :  { %1924 = vmatpush3.bf16.msra.mxu1 %v2108_v34 }
  0x6f   :  { %1985 = vmatprep.subr.bf16.mxu1 %v2439_v43  ;;  %579 = vmatmul.mubr.bf16.vlgmr.msra.gmra.mxu0 %v136_v37 }
  0x70   :  { %1932 = vmatpush3.bf16.msra.mxu0 %v2110_v42  ;;  %660 = vmatprep.mubr.bf16.mxu0 %v141_v61 }
  0x71   :  { %620 = vmatmul.mubr.bf16.vlgmr.msra.gmra.mxu1 %v138_v46  ;;  %1933 = vmatprep.subr.bf16.mxu0 %v2111_v47 }
  0x72   :  { %1987 = vmatprep.mubr.msk.bf16.mxu1 %vm2440_vm0, %v2439_v43  ;;  %1986 = vmatpush3.bf16.msra.mxu1 %v2125_v56 }
  0x73   :  { %1991 = vmatprep.subr.bf16.mxu1 %v2439_v43 }
  0x74   :  { %1934 = vmatpush3.bf16.msra.mxu0 %v2112_v48 }
  0x75   :  { %1935 = vmatprep.subr.bf16.mxu0 %v2113_v49 }
  0x78   :  { %1936 = vmatpush3.bf16.msra.mxu0 %v2114_v50 }
  0x79   :  { %1937 = vmatprep.subr.bf16.mxu0 %v2115_v51  ;;  %1988 = vmatmul.mubr.msk.bf16.vlgmr.msra.gmra.mxu1 %vm542_vm1, %v142_v0  ;;  %v2135_v51 = vld [vmem:[%s2698_s5 + $0x10] sm:$0xff]  }
  0x7a   :  { %2007 = vmatprep.mubr.msk.bf16.mxu1 %vm2440_vm0, %v2439_v43  ;;  %1992 = vmatpush3.bf16.msra.mxu1 %v2126_v7  ;;  %v2138_v0 = vld [vmem:[#allocation8] sm:$0x3f]  }
  0x7b   :  { %1993 = vmatprep.subr.bf16.mxu1 %v2439_v43 }
  0x7c   :  { %1938 = vmatpush3.bf16.msra.mxu0 %v2116_v52  ;;  %v2136_v52 = vld [vmem:[%s2698_s5 + $0x8] sm:$0xff]  }
  0x7d   :  { %1939 = vmatprep.subr.bf16.mxu0 %v2117_v53  ;;  %v2137_v53 = vld [vmem:[%s2698_s5] sm:$0xff]  }
  0x7e   :  { %1994 = vmatpush3.bf16.msra.mxu1 %v2127_v8 }
  0x7f   :  { %1995 = vmatprep.subr.bf16.mxu1 %v2439_v43 }
  0x80   :  { %1940 = vmatpush3.bf16.msra.mxu0 %v2118_v54  ;;  %v1793_v54 = vld [vmem:[#allocation5] ss:$0 sm:$0xff] }
  0x81   :  { %1941 = vmatprep.subr.bf16.mxu0 %v2119_v55 }
  0x82   :  { %1996 = vmatpush3.bf16.msra.mxu1 %v2128_v9 }
  0x83   :  { %1997 = vmatprep.subr.bf16.mxu1 %v2439_v43 }
  0x84   :  { %1942 = vmatpush3.bf16.msra.mxu0 %v2120_v58 }
  0x85   :  { %1943 = vmatprep.subr.bf16.mxu0 %v2121_v59 }
  0x86   :  { %1998 = vmatpush3.bf16.msra.mxu1 %v2129_v10 }
  0x87   :  { %1999 = vmatprep.subr.bf16.mxu1 %v2439_v43 }
  0x88   :  { %1944 = vmatpush3.bf16.msra.mxu0 %v2122_v1  ;;  %v933_v1 = vsel %vm931_vm3, %v2138_v0, 0 }
  0x89   :  { %1945 = vmatprep.subr.bf16.mxu0 %v2123_v2  ;;  %v2139_v2 = vld [vmem:[%s2702_s9 + $0x18] sm:$0xff]  }
  0x8a   :  { %2000 = vmatpush3.bf16.msra.mxu1 %v2130_v11  ;;  %v2140_v11 = vld [vmem:[%s2702_s9 + $0x10] sm:$0xff]  }
  0x8b   :  { %2001 = vmatprep.subr.bf16.mxu1 %v2439_v43 }
  0x8c   :  { %1946 = vmatpush3.bf16.msra.mxu0 %v2124_v3 }
  0x8d   :  { %2011 = vmatprep.subr.bf16.mxu0 %v2439_v43 }
  0x8e   :  { %2002 = vmatpush3.bf16.msra.mxu1 %v2131_v12  ;;  %v2141_v12 = vld [vmem:[%s2702_s9 + $0x8] sm:$0xff]  }
  0x8f   :  { %661 = vmatmul.mubr.bf16.vlgmr.msra.gmra.mxu0 %v140_v6  ;;  %2003 = vmatprep.subr.bf16.mxu1 %v2439_v43 }
  0x90   :  { %2019 = vmatprep.mubr.msk.bf16.mxu0 %vm2440_vm0, %v2439_v43  ;;  %2012 = vmatpush3.bf16.msra.mxu0 %v2134_v15  ;;  %v2145_v15 = vld [vmem:[#allocation11 + $0x18c] ss:$28 sps:$4 sm:$0xff]  }
  0x91   :  { %2013 = vmatprep.subr.bf16.mxu0 %v2439_v43 }
  0x92   :  { %2004 = vmatpush3.bf16.msra.mxu1 %v2132_v13  ;;  %v2142_v13 = vld [vmem:[%s2702_s9] sm:$0xff]  }
  0x93   :  { %2005 = vmatprep.subr.bf16.mxu1 %v2439_v43 }
  0x94   :  { %2014 = vmatpush3.bf16.msra.mxu0 %v2135_v51  ;;  %v2179_v51 = vld [vmem:[#allocation11 + $0x38] ss:$28 sps:$4 sm:$0xff]  }
  0x95   :  { %2015 = vmatprep.subr.bf16.mxu0 %v2439_v43 }
  0x96   :  { %2006 = vmatpush3.bf16.msra.mxu1 %v2133_v14  ;;  %v2143_v14 = vld [vmem:[#allocation11 + $0x188] ss:$28 sps:$4 sm:$0xff]  }
  0x97   :  { %2023 = vmatprep.subr.bf16.mxu1 %v2439_v43 }
  0x98   :  { %2016 = vmatpush3.bf16.msra.mxu0 %v2136_v52  ;;  %v2182_v52 = vld [vmem:[#allocation11 + $0x40] ss:$28 sps:$4 sm:$0xff]  }
  0x99   :  { %2017 = vmatprep.subr.bf16.mxu0 %v2439_v43 }
  0x9c   :  { %2018 = vmatpush3.bf16.msra.mxu0 %v2137_v53  ;;  %v2187_v53 = vld [vmem:[#allocation11 + $0x4] ss:$28 sps:$4 sm:$0xff]  }
  0x9d   :  { %2029 = vmatprep.subr.bf16.mxu0 %v2439_v43 }
 0x12f   :  { %v1903_v19 = vpop.f32.mrf.mxu0 }
 0x131   :  { %v1925_v16 = vpop.f32.mrf.mxu1  ;;  %v1904_v21 = vpop.f32.mrf.mxu0 }
 0x132   :  { %v1905_v27 = vadd.f32 %v1904_v21, %v1903_v19  ;;  %v2157_v19 = vld [vmem:[#allocation11 + $0x11c] ss:$28 sps:$4 sm:$0xff]   ;;  %v2163_v21 = vld [vmem:[#allocation11 + $0xe4] ss:$28 sps:$4 sm:$0xff]  }
 0x133   :  { %v1926_v17 = vpop.f32.mrf.mxu1  ;;  %v1906_v24 = vpop.f32.mrf.mxu0 }
 0x134   :  { %v581_v30 = vadd.f32 %v1905_v27, %v1742_v28  ;;  %v1927_v31 = vadd.f32 %v1926_v17, %v1925_v16  ;;  %v2148_v16 = vld [vmem:[#allocation11 + $0x194] ss:$28 sps:$4 sm:$0xff]   ;;  %v1808_v27 = vld [vmem:[#allocation10] ss:$0 sm:$0xff] }
 0x135   :  { %v1928_v18 = vpop.f32.mrf.mxu1  ;;  %v1907_v29 = vpop.f32.mrf.mxu0  ;;  %v2151_v17 = vld [vmem:[#allocation11 + $0x154] ss:$28 sps:$4 sm:$0xff]  }
 0x136   :  { %v1908_v32 = vadd.f32 %v1907_v29, %v1906_v24  ;;  %v622_v35 = vadd.f32 %v1927_v31, %v581_v30  ;;  %v2167_v24 = vld [vmem:[#allocation11 + $0xa8] ss:$28 sps:$4 sm:$0xff]  }
 0x137   :  { %v1929_v20 = vpop.f32.mrf.mxu1 }
 0x138   :  { %v584_v36 = vadd.f32 %v1908_v32, %v1742_v28  ;;  %v1930_v37 = vadd.f32 %v1929_v20, %v1928_v18  ;;  %v2149_v18 = vld [vmem:[#allocation11 + $0x150] ss:$28 sps:$4 sm:$0xff]   ;;  %v2155_v20 = vld [vmem:[#allocation11 + $0x118] ss:$28 sps:$4 sm:$0xff]  }
 0x139   :  { %v703_v22 = vpop.f32.mrf.mxu1 }
 0x13a   :  { %v625_v42 = vadd.f32 %v1930_v37, %v584_v36  ;;  %v2146_v36 = vld [vmem:[#allocation11 + $0x190] ss:$28 sps:$4 sm:$0xff]  }
 0x13b   :  { %v1989_v23 = vpop.f32.mrf.mxu1 }
 0x13c   :  { %v2169_v23 = vld [vmem:[#allocation11 + $0xac] ss:$28 sps:$4 sm:$0xff]  }
 0x13d   :  { %v706_v25 = vpop.f32.mrf.mxu1 }
 0x13f   :  { %v1990_v26 = vpop.f32.mrf.mxu1 }
 0x140   :  { %v2173_v26 = vld [vmem:[#allocation11 + $0x70] ss:$28 sps:$4 sm:$0xff]  }
 0x14f   :  { %v1947_v33 = vpop.f32.mrf.mxu0 }
 0x151   :  { %v1948_v34 = vpop.f32.mrf.mxu0 }
 0x152   :  { %v1949_v38 = vadd.f32 %v1948_v34, %v1947_v33 }
 0x153   :  { %v1950_v39 = vpop.f32.mrf.mxu0 }
 0x154   :  { %v663_v40 = vadd.f32 %v1949_v38, %v622_v35  ;;  %v2154_v38 = vld [vmem:[#allocation11 + $0x15c] ss:$28 sps:$4 sm:$0xff]  }
 0x155   :  { %v1951_v41 = vpop.f32.mrf.mxu0 }
 0x156   :  { %v1952_v44 = vadd.f32 %v1951_v41, %v1950_v39  ;;  %v704_v45 = vadd.f32 %v703_v22, %v663_v40  ;;  %v2161_v22 = vld [vmem:[#allocation11 + $0xe0] ss:$28 sps:$4 sm:$0xff]   ;;  %v2152_v39 = vld [vmem:[#allocation11 + $0x158] ss:$28 sps:$4 sm:$0xff]  }
 0x157   :  { %v2160_v40 = vld [vmem:[#allocation11 + $0x124] ss:$28 sps:$4 sm:$0xff]  }
 0x158   :  { %v666_v46 = vadd.f32 %v1952_v44, %v625_v42  ;;  %v710_v48 = vmax.f32 %v704_v45, 0.0  ;;  %v2158_v41 = vld [vmem:[#allocation11 + $0x120] ss:$28 sps:$4 sm:$0xff]   ;;  %v2166_v42 = vld [vmem:[#allocation11 + $0xec] ss:$28 sps:$4 sm:$0xff]  }
 0x159   :  { %v2164_v44 = vld [vmem:[#allocation11 + $0xe8] ss:$28 sps:$4 sm:$0xff]   ;;  %v2172_v45 = vld [vmem:[#allocation11 + $0xb4] ss:$28 sps:$4 sm:$0xff]  }
 0x15a   :  { %v707_v47 = vadd.f32 %v706_v25, %v666_v46  ;;  %v2175_v25 = vld [vmem:[#allocation11 + $0x74] ss:$28 sps:$4 sm:$0xff]  }
 0x15b   :  { %v2170_v46 = vld [vmem:[#allocation11 + $0xb0] ss:$28 sps:$4 sm:$0xff]  }
 0x15c   :  { %v711_v49 = vmax.f32 %v707_v47, 0.0  ;;  %v2178_v47 = vld [vmem:[#allocation11 + $0x7c] ss:$28 sps:$4 sm:$0xff]  }
 0x15e   :  { %v712_v50 = vpack.c.bf16 %v711_v49, %v710_v48  ;;  %v2176_v48 = vld [vmem:[#allocation11 + $0x78] ss:$28 sps:$4 sm:$0xff]  }
 0x15f   :  { %v2181_v49 = vld [vmem:[#allocation11 + $0x3c] ss:$28 sps:$4 sm:$0xff]  }
 0x160   :  { %2008 = vmatmul.mubr.bf16.vlgmr.msra.gmra.mxu1 %v712_v50  ;;  %v2184_v50 = vld [vmem:[#allocation11 + $0x44] ss:$28 sps:$4 sm:$0xff]  }
 0x161   :  { %2025 = vmatprep.mubr.msk.bf16.mxu1 %vm2440_vm0, %v2439_v43  ;;  %2024 = vmatpush3.bf16.msra.mxu1 %v933_v1 }
 0x162   :  { %1454 = vmatprep.subr.bf16.mxu1 %v2145_v15  ;;  %v2206_v15 = vld [vmem:[#allocation11 + $0xf8] ss:$28 sps:$4 sm:$0xff]  }
 0x220   :  { %v818_v55 = vpop.f32.mrf.mxu1 }
 0x221   :  { %v819_v57 = vadd.f32 %v1793_v54, %v818_v55  ;;  %v2185_v55 = vld [vmem:[#allocation11] ss:$28 sps:$4 sm:$0xff]  }
 0x222   :  { %v2009_v56 = vpop.f32.mrf.mxu1 }
 0x223   :  { %v825_v61 = vmax.f32 %v819_v57, 0.0  ;;  %v2188_v56 = vld [vmem:[#allocation11 + $0x8] ss:$28 sps:$4 sm:$0xff]   ;;  %v2193_v57 = vld [vmem:[#allocation11 + $0x19c] ss:$28 sps:$4 sm:$0xff]  }
 0x224   :  { %v821_v58 = vpop.f32.mrf.mxu1 }
 0x225   :  { %v822_v59 = vadd.f32 %v1793_v54, %v821_v58  ;;  %v2190_v54 = vld [vmem:[#allocation11 + $0xc] ss:$28 sps:$4 sm:$0xff]   ;;  %v2441_v58 = vmov 0  }
 0x226   :  { %v2010_v60 = vpop.f32.mrf.mxu1 }
 0x227   :  { %v826_v62 = vmax.f32 %v822_v59, 0.0  ;;  %v1811_v59 = vld [vmem:[%s2703_s10] ss:$0 sm:$0xff] }
 0x229   :  { %v827_v63 = vpack.c.bf16 %v826_v62, %v825_v61 }
 0x22b   :  { %2020 = vmatmul.mubr.msk.bf16.vlgmr.msra.gmra.mxu0 %vm867_vm2, %v827_v63 }
 0x22c   :  { %2037 = vmatprep.mubr.msk.bf16.mxu0 %vm2440_vm0, %v2439_v43  ;;  %2030 = vmatpush3.bf16.msra.mxu0 %v2139_v2 }
 0x22d   :  { %2031 = vmatprep.subr.bf16.mxu0 %v2439_v43 }
 0x230   :  { %2032 = vmatpush3.bf16.msra.mxu0 %v2140_v11  ;;  %v2199_v11 = vld [vmem:[#allocation11 + $0x128] ss:$28 sps:$4 sm:$0xff]  }
 0x231   :  { %2033 = vmatprep.subr.bf16.mxu0 %v2439_v43 }
 0x234   :  { %2034 = vmatpush3.bf16.msra.mxu0 %v2141_v12  ;;  %v2202_v12 = vld [vmem:[#allocation11 + $0x130] ss:$28 sps:$4 sm:$0xff]  }
 0x235   :  { %2035 = vmatprep.subr.bf16.mxu0 %v2439_v43 }
 0x238   :  { %2036 = vmatpush3.bf16.msra.mxu0 %v2142_v13  ;;  %v2205_v13 = vld [vmem:[#allocation11 + $0xf4] ss:$28 sps:$4 sm:$0xff]  }
 0x239   :  { %1497 = vmatprep.subr.bf16.mxu0 %v2148_v16  ;;  %v2209_v16 = vld [vmem:[#allocation11 + $0xbc] ss:$28 sps:$4 sm:$0xff]  }
 0x2eb   :  { %v905_v3 = vpop.f32.mrf.mxu0 }
 0x2ec   :  { %v906_v7 = vadd.f32 %v1802_v4, %v905_v3 }
 0x2ed   :  { %v2021_v5 = vpop.f32.mrf.mxu0 }
 0x2ee   :  { %v2194_v5 = vld [vmem:[#allocation11 + $0x1a0] ss:$28 sps:$4 sm:$0xff]  }
 0x2ef   :  { %v908_v6 = vpop.f32.mrf.mxu0 }
 0x2f0   :  { %v909_v8 = vadd.f32 %v1802_v4, %v908_v6  ;;  %v2191_v4 = vld [vmem:[#allocation11 + $0x198] ss:$28 sps:$4 sm:$0xff]  }
 0x2f1   :  { %v2022_v9 = vpop.f32.mrf.mxu0 }
 0x2f2   :  { %v912_v10 = vpack.c.bf16 %v909_v8, %v906_v7  ;;  %v2197_v7 = vld [vmem:[#allocation11 + $0x164] ss:$28 sps:$4 sm:$0xff]  }
 0x2f3   :  { %v2195_v8 = vld [vmem:[#allocation11 + $0x160] ss:$28 sps:$4 sm:$0xff]   ;;  %v2198_v9 = vld [vmem:[#allocation11 + $0x168] ss:$28 sps:$4 sm:$0xff]  }
 0x2f4   :  { %2026 = vmatmul.mubr.msk.bf16.vlgmr.msra.gmra.mxu1 %vm927_vm4, %v912_v10  ;;  %v2201_v10 = vld [vmem:[#allocation11 + $0x12c] ss:$28 sps:$4 sm:$0xff]  }
 0x2f5   :  { %1455 = vmatpush1.bf16.msra.mxu1 %v2143_v14  ;;  %1486 = vmatprep.mubr.bf16.mxu1 %v2441_v58  ;;  %v2203_v14 = vld [vmem:[#allocation11 + $0xf0] ss:$28 sps:$4 sm:$0xff]  }
 0x2f6   :  { %1456 = vmatprep.subr.bf16.mxu1 %v2151_v17  ;;  %v2207_v17 = vld [vmem:[#allocation11 + $0xb8] ss:$28 sps:$4 sm:$0xff]  }
 0x2f9   :  { %1457 = vmatpush1.bf16.msra.mxu1 %v2149_v18  ;;  %v2210_v18 = vld [vmem:[#allocation11 + $0xc0] ss:$28 sps:$4 sm:$0xff]  }
 0x2fa   :  { %1458 = vmatprep.subr.bf16.mxu1 %v2157_v19  ;;  %v2213_v19 = vld [vmem:[#allocation11 + $0x84] ss:$28 sps:$4 sm:$0xff]  }
 0x2fd   :  { %1459 = vmatpush1.bf16.msra.mxu1 %v2155_v20  ;;  %v2211_v20 = vld [vmem:[#allocation11 + $0x80] ss:$28 sps:$4 sm:$0xff]  }
 0x2fe   :  { %1460 = vmatprep.subr.bf16.mxu1 %v2163_v21  ;;  %v2214_v21 = vld [vmem:[#allocation11 + $0x88] ss:$28 sps:$4 sm:$0xff]  }
 0x301   :  { %1461 = vmatpush1.bf16.msra.mxu1 %v2161_v22  ;;  %v2217_v22 = vld [vmem:[#allocation11 + $0x4c] ss:$28 sps:$4 sm:$0xff]  }
 0x302   :  { %1462 = vmatprep.subr.bf16.mxu1 %v2169_v23  ;;  %v2215_v23 = vld [vmem:[#allocation11 + $0x48] ss:$28 sps:$4 sm:$0xff]  }
 0x305   :  { %1463 = vmatpush1.bf16.msra.mxu1 %v2167_v24  ;;  %v2218_v24 = vld [vmem:[#allocation11 + $0x50] ss:$28 sps:$4 sm:$0xff]  }
 0x306   :  { %1464 = vmatprep.subr.bf16.mxu1 %v2175_v25  ;;  %v2221_v25 = vld [vmem:[#allocation11 + $0x14] ss:$28 sps:$4 sm:$0xff]  }
 0x309   :  { %1465 = vmatpush1.bf16.msra.mxu1 %v2173_v26  ;;  %v2219_v26 = vld [vmem:[#allocation11 + $0x10] ss:$28 sps:$4 sm:$0xff]  }
 0x30a   :  { %1466 = vmatprep.subr.bf16.mxu1 %v2181_v49 }
 0x30d   :  { %1467 = vmatpush1.bf16.msra.mxu1 %v2179_v51 }
 0x30e   :  { %1468 = vmatprep.subr.bf16.mxu1 %v2187_v53 }
 0x311   :  { %1469 = vmatpush1.bf16.msra.mxu1 %v2185_v55 }
 0x312   :  { %1540 = vmatprep.subr.bf16.mxu1 %v2193_v57 }
 0x3b4   :  { %v969_v28 = vpop.f32.mrf.mxu1 }
 0x3b5   :  { %v970_v30 = vadd.f32 %v1808_v27, %v969_v28  ;;  %v1131_v28 = vlaneseq }
 0x3b6   :  { %v2027_v29 = vpop.f32.mrf.mxu1 }
 0x3b7   :  { %v976_v34 = vmax.f32 %v970_v30, 0.0  ;;  %v2669_v29 = vshrl.u32 %v1131_v28, 7 }
 0x3b8   :  { %v972_v31 = vpop.f32.mrf.mxu1 }
 0x3b9   :  { %v973_v32 = vadd.f32 %v1808_v27, %v972_v31  ;;  %v2222_v27 = vld [vmem:[#allocation11 + $0x18] ss:$28 sps:$4 sm:$0xff]   ;;  %v1133_v30 = vsub.s32 0, %v2669_v29  ;;  %v1141_v31 = vsub.s32 2, %v2669_v29 }
 0x3ba   :  { %v2028_v33 = vpop.f32.mrf.mxu1 }
 0x3bb   :  { %v977_v35 = vmax.f32 %v973_v32, 0.0  ;;  %v2676_v32 = vld [vmem:[%s2705_s12] sm:$0xff]  ;;  %v1137_v33 = vsub.s32 1, %v2669_v29  ;;  %s2442_s12 = smov [#allocation13]  }
 0x3bc   :  { %s1727_s1 = sshll.u32 %s2442_s12, 4  ;;  %s1728_s1 = int_to_ptr.vmem [resolvable:$true] %s1727_s1 }
 0x3bd   :  { %v978_v37 = vpack.c.bf16 %v977_v35, %v976_v34  ;;  %v1134_v34 = vrot.slane %v2676_v32, %v1133_v30  ;;  %v1142_v35 = vrot.slane %v2676_v32, %v1141_v31  ;;  %s2399_s16 = scalar_lea.vmem %s1728_s1, 1792  ;;  %p2404_p3 = scmp.lt.s32.totalorder %s1728_s1, %s1728_s1 }
 0x3be   :  { %p2400_p2 = scmp.ne.s32.totalorder %s1728_s1, %s2399_s16  ;;  %p2405_p4 = scmp.lt.s32.totalorder %s2399_s16, %s2399_s16 }
 0x3bf   :  { %2038 = vmatmul.mubr.msk.bf16.vlgmr.msra.gmra.mxu0 %vm867_vm2, %v978_v37 }
 0x3c0   :  { %1498 = vmatpush1.bf16.msra.mxu0 %v2146_v36  ;;  %1529 = vmatprep.mubr.bf16.mxu0 %v2441_v58  ;;  %v1138_v36 = vrot.slane %v2676_v32, %v1137_v33  ;;  %p2406_p5 = por %p2405_p4, %p2404_p3 }
 0x3c1   :  { %1499 = vmatprep.subr.bf16.mxu0 %v2154_v38 }
 0x3c2   :  { %p2407_p6 = pnand %p2406_p5, %p2400_p2 }
 0x3c4   :  { %1500 = vmatpush1.bf16.msra.mxu0 %v2152_v39 }
 0x3c5   :  { %1501 = vmatprep.subr.bf16.mxu0 %v2160_v40 }
 0x3c8   :  { %1502 = vmatpush1.bf16.msra.mxu0 %v2158_v41 }
 0x3c9   :  { %1503 = vmatprep.subr.bf16.mxu0 %v2166_v42 }
 0x3cc   :  { %1504 = vmatpush1.bf16.msra.mxu0 %v2164_v44 }
 0x3cd   :  { %1505 = vmatprep.subr.bf16.mxu0 %v2172_v45 }
 0x3d0   :  { %1506 = vmatpush1.bf16.msra.mxu0 %v2170_v46 }
 0x3d1   :  { %1507 = vmatprep.subr.bf16.mxu0 %v2178_v47 }
 0x3d4   :  { %1508 = vmatpush1.bf16.msra.mxu0 %v2176_v48 }
 0x3d5   :  { %1509 = vmatprep.subr.bf16.mxu0 %v2184_v50 }
 0x3d8   :  { %1510 = vmatpush1.bf16.msra.mxu0 %v2182_v52 }
 0x3d9   :  { %1511 = vmatprep.subr.bf16.mxu0 %v2190_v54 }
 0x3dc   :  { %1512 = vmatpush1.bf16.msra.mxu0 %v2188_v56 }
 0x3dd   :  { %2041 = vmatprep.subr.bf16.mxu0 %v2439_v43 }
 0x47f   :  { %v1055_v60 = vpop.f32.mrf.mxu0 }
 0x480   :  { %v1056_v62 = vadd.f32 %v1811_v59, %v1055_v60 }
 0x481   :  { %v2039_v61 = vpop.f32.mrf.mxu0 }
 0x482   :  { %v1062_v2 = vmax.f32 %v1056_v62, 0.0 }
 0x483   :  { %v1058_v63 = vpop.f32.mrf.mxu0 }
 0x484   :  { %v1059_v0 = vadd.f32 %v1811_v59, %v1058_v63 }
 0x485   :  { %v2040_v1 = vpop.f32.mrf.mxu0 }
 0x486   :  { %v1063_v3 = vmax.f32 %v1059_v0, 0.0 }
 0x488   :  { %v1064_v6 = vpack.c.bf16 %v1063_v3, %v1062_v2 }
 0x48a   :  { %1487 = vmatmul.mubr.bf16.vlgmr.msra.gmra.mxu1 %v1064_v6  ;;  %1530 = vmatmul.mubr.bf16.vlgmr.msra.gmra.mxu0 %v1064_v6 }
 0x48b   :  { %1541 = vmatpush1.bf16.msra.mxu1 %v2191_v4  ;;  %2042 = vmatpush3.bf16.msra.mxu0 %v2194_v5 }
 0x48c   :  { %1542 = vmatprep.subr.bf16.mxu1 %v2197_v7  ;;  %2043 = vmatprep.subr.bf16.mxu0 %v2439_v43 }
 0x48d   :  { %1572 = vmatprep.mubr.bf16.mxu1 %v2441_v58  ;;  %2057 = vmatprep.mubr.msk.bf16.mxu0 %vm2440_vm0, %v2439_v43 }
 0x48f   :  { %1543 = vmatpush1.bf16.msra.mxu1 %v2195_v8  ;;  %2044 = vmatpush3.bf16.msra.mxu0 %v2198_v9 }
 0x490   :  { %1544 = vmatprep.subr.bf16.mxu1 %v2201_v10  ;;  %2045 = vmatprep.subr.bf16.mxu0 %v2439_v43 }
 0x493   :  { %1545 = vmatpush1.bf16.msra.mxu1 %v2199_v11  ;;  %2046 = vmatpush3.bf16.msra.mxu0 %v2202_v12 }
 0x494   :  { %1546 = vmatprep.subr.bf16.mxu1 %v2205_v13  ;;  %2047 = vmatprep.subr.bf16.mxu0 %v2439_v43 }
 0x497   :  { %1547 = vmatpush1.bf16.msra.mxu1 %v2203_v14  ;;  %2048 = vmatpush3.bf16.msra.mxu0 %v2206_v15  ;;  %v1149_v14 = vsub.s32 4, %v2669_v29  ;;  %v1157_v15 = vsub.s32 6, %v2669_v29 }
 0x498   :  { %1548 = vmatprep.subr.bf16.mxu1 %v2209_v16  ;;  %2049 = vmatprep.subr.bf16.mxu0 %v2439_v43 }
 0x49b   :  { %1549 = vmatpush1.bf16.msra.mxu1 %v2207_v17  ;;  %2050 = vmatpush3.bf16.msra.mxu0 %v2210_v18  ;;  %v1153_v17 = vsub.s32 5, %v2669_v29  ;;  %v1150_v18 = vrot.slane %v2676_v32, %v1149_v14 }
 0x49c   :  { %1550 = vmatprep.subr.bf16.mxu1 %v2213_v19  ;;  %2051 = vmatprep.subr.bf16.mxu0 %v2439_v43  ;;  %v1158_v19 = vrot.slane %v2676_v32, %v1157_v15 }
 0x49f   :  { %1551 = vmatpush1.bf16.msra.mxu1 %v2211_v20  ;;  %2052 = vmatpush3.bf16.msra.mxu0 %v2214_v21  ;;  %v1154_v20 = vrot.slane %v2676_v32, %v1153_v17 }
 0x4a0   :  { %1552 = vmatprep.subr.bf16.mxu1 %v2217_v22  ;;  %2053 = vmatprep.subr.bf16.mxu0 %v2439_v43 }
 0x4a3   :  { %1553 = vmatpush1.bf16.msra.mxu1 %v2215_v23  ;;  %2054 = vmatpush3.bf16.msra.mxu0 %v2218_v24 }
 0x4a4   :  { %1554 = vmatprep.subr.bf16.mxu1 %v2221_v25  ;;  %2055 = vmatprep.subr.bf16.mxu0 %v2439_v43  ;;  %v1145_v43 = vsub.s32 3, %v2669_v29 }
 0x4a6   :  { %v1146_v37 = vrot.slane %v2676_v32, %v1145_v43 }
 0x4a7   :  { %1555 = vmatpush1.bf16.msra.mxu1 %v2219_v26  ;;  %2056 = vmatpush3.bf16.msra.mxu0 %v2222_v27 }
 0x4aa   :  { %1573 = vmatmul.mubr.bf16.vlgmr.msra.gmra.mxu1 %v1064_v6  ;;  %2058 = vmatmul.mubr.bf16.vlgmr.msra.gmra.mxu0 %v1064_v6 }
 0x54a   :  { %v1488_v38 = vpop.f32.mrf.mxu1  ;;  %v1531_v39 = vpop.f32.mrf.mxu0 }
 0x54b   :  { %v1489_v40 = vadd.f32 %v1488_v38, %v1134_v34  ;;  %v1532_v41 = vadd.f32 %v1531_v39, %v1142_v35 }
 0x54c   :  { %v1490_v42 = vpop.f32.mrf.mxu1  ;;  %v1533_v44 = vpop.f32.mrf.mxu0 }
 0x54d   :  { %v1873_v45 = vmul.f32 -1.442695, %v1489_v40  ;;  %v1875_v46 = vmul.f32 -1.442695, %v1532_v41  ;;  %v1491_v47 = vadd.f32 %v1490_v42, %v1138_v36  ;;  %v1534_v48 = vadd.f32 %v1533_v44, %v1146_v37 }
 0x54e   :  { %v1492_v49 = vpop.f32.mrf.mxu1  ;;  %v1535_v50 = vpop.f32.mrf.mxu0 }
 0x54f   :  { %2223 = vpow2.f32 %v1873_v45  ;;  %v1874_v51 = vmul.f32 -1.442695, %v1491_v47  ;;  %v1876_v52 = vmul.f32 -1.442695, %v1534_v48  ;;  %v1493_v53 = vadd.f32 %v1492_v49, %v1134_v34 }
 0x550   :  { %2225 = vpow2.f32 %v1875_v46  ;;  %v1536_v54 = vadd.f32 %v1535_v50, %v1142_v35  ;;  %v1494_v55 = vpop.f32.mrf.mxu1  ;;  %v1537_v56 = vpop.f32.mrf.mxu0 }
 0x551   :  { %2227 = vpow2.f32 %v1874_v51  ;;  %v1880_v57 = vmul.f32 -1.442695, %v1493_v53  ;;  %v1495_v58 = vadd.f32 %v1494_v55, %v1138_v36  ;;  %v1538_v59 = vadd.f32 %v1537_v56, %v1146_v37 }
 0x552   :  { %2229 = vpow2.f32 %v1876_v52  ;;  %v1882_v60 = vmul.f32 -1.442695, %v1536_v54 }
 0x553   :  { %2231 = vpow2.f32 %v1880_v57  ;;  %v1881_v61 = vmul.f32 -1.442695, %v1495_v58  ;;  %v1883_v62 = vmul.f32 -1.442695, %v1538_v59 }
 0x554   :  { %2233 = vpow2.f32 %v1882_v60 }
 0x555   :  { %2235 = vpow2.f32 %v1881_v61 }
 0x556   :  { %2237 = vpow2.f32 %v1883_v62 }
 0x55c   :  { %v2224_v63 = vpop.eup %2223 }
 0x55d   :  { %v2226_v0 = vpop.eup %2225  ;;  %v1666_v1 = vadd.f32 1.0, %v2224_v63 }
 0x55e   :  { %v2228_v2 = vpop.eup %2227  ;;  %v1668_v3 = vadd.f32 1.0, %v2226_v0 }
 0x55f   :  { %v2230_v4 = vpop.eup %2229  ;;  %2239 = vrcp.f32 %v1666_v1  ;;  %v1667_v5 = vadd.f32 1.0, %v2228_v2 }
 0x560   :  { %v2232_v6 = vpop.eup %2231  ;;  %2241 = vrcp.f32 %v1668_v3  ;;  %v1669_v7 = vadd.f32 1.0, %v2230_v4 }
 0x561   :  { %v2234_v8 = vpop.eup %2233  ;;  %2243 = vrcp.f32 %v1667_v5  ;;  %v1673_v9 = vadd.f32 1.0, %v2232_v6 }
 0x562   :  { %v2236_v10 = vpop.eup %2235  ;;  %2245 = vrcp.f32 %v1669_v7  ;;  %v1675_v11 = vadd.f32 1.0, %v2234_v8 }
 0x563   :  { %v2238_v12 = vpop.eup %2237  ;;  %2247 = vrcp.f32 %v1673_v9  ;;  %v1674_v13 = vadd.f32 1.0, %v2236_v10 }
 0x564   :  { %2249 = vrcp.f32 %v1675_v11  ;;  %v1676_v16 = vadd.f32 1.0, %v2238_v12 }
 0x565   :  { %2251 = vrcp.f32 %v1674_v13 }
 0x566   :  { %2253 = vrcp.f32 %v1676_v16 }
 0x56a   :  { %v1574_v21 = vpop.f32.mrf.mxu1  ;;  %v1617_v22 = vpop.f32.mrf.mxu0 }
 0x56b   :  { %v1575_v23 = vadd.f32 %v1574_v21, %v1150_v18  ;;  %v1618_v24 = vadd.f32 %v1617_v22, %v1158_v19 }
 0x56c   :  { %v2240_v25 = vpop.eup %2239  ;;  %v1576_v26 = vpop.f32.mrf.mxu1 }
 0x56d   :  { %v2059_v27 = vpop.f32.mrf.mxu0  ;;  %v2242_v28 = vpop.eup %2241  ;;  %1708 = vst [vmem:[#allocation13] sm:$0xff] %v2240_v25  ;;  %v1877_v30 = vmul.f32 -1.442695, %v1575_v23  ;;  %v1879_v31 = vmul.f32 -1.442695, %v1618_v24  ;;  %v1577_v33 = vadd.f32 %v1576_v26, %v1154_v20 }
 0x56e   :  { %v2244_v29 = vpop.eup %2243  ;;  %1710 = vst [vmem:[#allocation13 + $0x10] sm:$0xff] %v2242_v28  ;;  %v1578_v43 = vpop.f32.mrf.mxu1 }
 0x56f   :  { %v1620_v34 = vpop.f32.mrf.mxu0  ;;  %v2246_v35 = vpop.eup %2245  ;;  %1709 = vst [vmem:[#allocation13 + $0x8] sm:$0xff] %v2244_v29  ;;  %2255 = vpow2.f32 %v1877_v30  ;;  %v1878_v32 = vmul.f32 -1.442695, %v1577_v33  ;;  %v1579_v36 = vadd.f32 %v1578_v43, %v1150_v18 }
 0x570   :  { %v1621_v37 = vadd.f32 %v1620_v34, %v1158_v19  ;;  %v2248_v38 = vpop.eup %2247  ;;  %1711 = vst [vmem:[#allocation13 + $0x18] sm:$0xff] %v2246_v35  ;;  %2257 = vpow2.f32 %v1879_v31  ;;  %v1580_v39 = vpop.f32.mrf.mxu1 }
 0x571   :  { %v2060_v40 = vpop.f32.mrf.mxu0  ;;  %v2250_v41 = vpop.eup %2249  ;;  %1715 = vst [vmem:[#allocation13 + $0x38] sm:$0xff] %v2248_v38  ;;  %2259 = vpow2.f32 %v1878_v32  ;;  %v1884_v42 = vmul.f32 -1.442695, %v1579_v36  ;;  %v1581_v45 = vadd.f32 %v1580_v39, %v1154_v20 }
 0x572   :  { %v1886_v44 = vmul.f32 -1.442695, %v1621_v37  ;;  %v2252_v46 = vpop.eup %2251  ;;  %1717 = vst [vmem:[#allocation13 + $0x48] sm:$0xff] %v2250_v41 }
 0x573   :  { %v2254_v47 = vpop.eup %2253  ;;  %1716 = vst [vmem:[#allocation13 + $0x40] sm:$0xff] %v2252_v46  ;;  %2261 = vpow2.f32 %v1884_v42  ;;  %v1885_v48 = vmul.f32 -1.442695, %v1581_v45 }
 0x574   :  { %1718 = vst [vmem:[#allocation13 + $0x50] sm:$0xff] %v2254_v47  ;;  %2263 = vpow2.f32 %v1886_v44 }
 0x575   :  { %2265 = vpow2.f32 %v1885_v48 }
 0x57c   :  { %v2256_v49 = vpop.eup %2255 }
 0x57d   :  { %v2258_v50 = vpop.eup %2257  ;;  %v1670_v51 = vadd.f32 1.0, %v2256_v49 }
 0x57e   :  { %v2260_v52 = vpop.eup %2259  ;;  %v1672_v53 = vadd.f32 1.0, %v2258_v50 }
 0x57f   :  { %2267 = vrcp.f32 %v1670_v51  ;;  %v1671_v54 = vadd.f32 1.0, %v2260_v52 }
 0x580   :  { %v2262_v55 = vpop.eup %2261  ;;  %2269 = vrcp.f32 %v1672_v53 }
 0x581   :  { %v2264_v56 = vpop.eup %2263  ;;  %2271 = vrcp.f32 %v1671_v54  ;;  %v1677_v57 = vadd.f32 1.0, %v2262_v55 }
 0x582   :  { %v2266_v58 = vpop.eup %2265  ;;  %v1679_v59 = vadd.f32 1.0, %v2264_v56 }
 0x583   :  { %2273 = vrcp.f32 %v1677_v57  ;;  %v1678_v60 = vadd.f32 1.0, %v2266_v58 }
 0x584   :  { %2275 = vrcp.f32 %v1679_v59 }
 0x585   :  { %2277 = vrcp.f32 %v1678_v60 }
 0x58c   :  { %v2268_v61 = vpop.eup %2267 }
 0x58d   :  { %v2270_v62 = vpop.eup %2269  ;;  %1712 = vst [vmem:[#allocation13 + $0x20] sm:$0xff] %v2268_v61 }
 0x58e   :  { %v2272_v63 = vpop.eup %2271  ;;  %1714 = vst [vmem:[#allocation13 + $0x30] sm:$0xff] %v2270_v62 }
 0x58f   :  { %1713 = vst [vmem:[#allocation13 + $0x28] sm:$0xff] %v2272_v63 }
 0x590   :  { %v2274_v0 = vpop.eup %2273 }
 0x591   :  { %v2276_v1 = vpop.eup %2275  ;;  %1719 = vst [vmem:[#allocation13 + $0x58] sm:$0xff] %v2274_v0 }
 0x592   :  { %v2278_v2 = vpop.eup %2277  ;;  %1721 = vst [vmem:[#allocation13 + $0x68] sm:$0xff] %v2276_v1 }
 0x593   :  { %1720 = vst [vmem:[#allocation13 + $0x60] sm:$0xff] %v2278_v2 }
 0x594   :  { %2410 = shalt.err (!%p2407_p6)
}
 0x595   :  { %s2443_s17 = smov 896   ;;  %s2444_s18 = smov 56  }
 0x596   :  { %1733 = dma.vmem_to_hbm [thread:$0]  %s1728_s1, 1792, %s2706_s13, [#allocation4], %s2443_s17, %s2443_s17, %s2444_s18  }
 0x597   :  { %2427 = dma.done.wait [#allocation4], 1792  }
 0x598   :  { %2428 = vsyncadd [#allocation4], 4294965504 }
 0x599   :  { %1737 = vsyncpa [#allocation3], 1 }
 0x59a   :  { %1738 = vsyncpa [#allocation6], 1 }
 0x59b   :  { %1739 = vsyncpa [#allocation9], 1 }
 0x59c   :  { %1740 = vsyncpa [#allocation12], 1 }
 0x59d   :  { %1741 = vsyncpa [#allocation4], 1 }

</bundles_post_ra>
